<compile_context>
chip_gen: v7x
topology: tpu7x:2x2x1
jax: 0.10.0
libtpu: 0.0.40
codegen_flags: <defaults>
</compile_context>

<pallas_src>
import jax
import jax.numpy as jnp
from jax.experimental import pallas as pl
from jax.experimental.pallas import tpu as pltpu

LANES = 128


def sage_conv_kernel(x_all_ref, adj_ref, x_tile_ref, inv_deg_ref,
                     w_l_ref, w_r_ref, b_ref, o_ref):
    """One output-row tile of SAGEConv(mean) + ReLU.

    x_all_ref:   [N, F]   bf16  all node features (neighbor-aggregation RHS)
    adj_ref:     [tm, N]  bf16  dense 0/1 adjacency row tile (row i = in-neighbors of i)
    x_tile_ref:  [tm, F]  f32   this tile's own features (self/root branch)
    inv_deg_ref: [tm, 1]  f32   precomputed 1 / max(deg, 1)
    w_l_ref:     [F, Cp]  f32   lane-padded neighbor weight
    w_r_ref:     [F, Cp]  f32   lane-padded root weight
    b_ref:       [1, Cp]  f32   lane-padded bias
    o_ref:       [tm, Cp] f32   lane-dense output tile
    """
    # Dominant contraction: bf16 x bf16 -> f32-accumulated [tm, F] on the MXU.
    agg = jnp.dot(adj_ref[...], x_all_ref[...],
                  preferred_element_type=jnp.float32)            # [tm, F]
    agg = agg * inv_deg_ref[...]                                 # mean over neighbors

    # Small f32 projections (F -> Cp) for the neighbor and self branches.
    h = jnp.dot(agg, w_l_ref[...], preferred_element_type=jnp.float32)           # [tm, Cp]
    s = jnp.dot(x_tile_ref[...], w_r_ref[...], preferred_element_type=jnp.float32)

    o_ref[...] = jnp.maximum(h + s + b_ref[...], 0.0)


def graphsage1_forward(x, adj, w_l, w_r, bias, *, row_tile=None):
    """x: [N, F] f32, adj: [N, N] binary 0/1, w_l/w_r: [F, C] (pre-transposed,
    i.e. out = x @ w, matching PyTorch x @ W.T), bias: [1, C]."""
    N, F = x.shape
    C = w_l.shape[1]
    Cp = pl.cdiv(C, LANES) * LANES                 # lane-pad class dim to 128

    # Lane-pad the class dim so the in-kernel output store is lane-dense; extra
    # columns are zero and sliced off below.
    w_l_p = jnp.zeros((F, Cp), jnp.float32).at[:, :C].set(w_l.astype(jnp.float32))
    w_r_p = jnp.zeros((F, Cp), jnp.float32).at[:, :C].set(w_r.astype(jnp.float32))
    b_p = jnp.zeros((1, Cp), jnp.float32).at[:, :C].set(bias.astype(jnp.float32))

    # NOTE: adjacency must be binary 0/1 -- exact in bf16 (halves adj DMA bytes).
    # TODO(synk): at large N, store adj as int8 (widen in-kernel, tm % 32) and
    # tile the neighbor/contraction dim with a pl.when-guarded accumulator so
    # adj row tiles + x fit v7x's 64 MiB VMEM (set vmem_limit_bytes accordingly).
    adj_bf16 = adj.astype(jnp.bfloat16)
    x_bf16 = x.astype(jnp.bfloat16)      # aggregation RHS (bf16 MXU path)
    x_f32 = x.astype(jnp.float32)        # self branch stays f32

    # Degree reciprocal computed once in XLA (not N/tm times in-kernel).
    deg = jnp.maximum(jnp.sum(adj.astype(jnp.float32), axis=-1, keepdims=True), 1.0)
    inv_deg = (1.0 / deg).astype(jnp.float32)

    # Row tiling: multiples of 16 rows (bf16 adjacency sublane packing; also
    # covers the f32 output's 8-row tile). Default gives >=2 grid steps so the
    # 'parallel' axis can shard across v7x's two TensorCores; 256 rows at scale.
    if row_tile is None:
        tm = 256 if (N >= 512 and N % 256 == 0) else max(16, N // 2)
    else:
        tm = row_tile
    assert N % tm == 0 and tm % 16 == 0, "row tile must divide N and be a multiple of 16"
    grid = (N // tm,)

    out_p = pl.pallas_call(
        sage_conv_kernel,
        out_shape=jax.ShapeDtypeStruct((N, Cp), jnp.float32),
        grid=grid,
        in_specs=[
            pl.BlockSpec((N, F), lambda i: (0, 0)),       # x, all rows (bf16)
            pl.BlockSpec((tm, N), lambda i: (i, 0)),      # adjacency row tile (bf16)
            pl.BlockSpec((tm, F), lambda i: (i, 0)),      # x row tile (f32, self branch)
            pl.BlockSpec((tm, 1), lambda i: (i, 0)),      # 1/deg row tile
            pl.BlockSpec((F, Cp), lambda i: (0, 0)),      # W_l (padded)
            pl.BlockSpec((F, Cp), lambda i: (0, 0)),      # W_r (padded)
            pl.BlockSpec((1, Cp), lambda i: (0, 0)),      # bias (padded)
        ],
        out_specs=pl.BlockSpec((tm, Cp), lambda i: (i, 0)),
        compiler_params=pltpu.CompilerParams(
            dimension_semantics=("parallel",)),
    )(x_bf16, adj_bf16, x_f32, inv_deg, w_l_p, w_r_p, b_p)

    # TODO(synk): let the consumer accept the padded [N, Cp] slab to skip this copy.
    return out_p[:, :C]


def reference_forward(x, adj, w_l, w_r, bias):
    deg = jnp.maximum(jnp.sum(adj, axis=-1, keepdims=True), 1.0)
    agg = (adj @ x) / deg
    out = agg @ w_l + bias + x @ w_r
    return jnp.maximum(out, 0.0)


if __name__ == "__main__":
    # Small shapes consistent with the module: N nodes, nfeat input features,
    # nclass output classes (GraphSAGE1 = single SAGEConv(nfeat, nclass) + ReLU).
    N, NFEAT, NCLASS = 64, 32, 16

    key = jax.random.PRNGKey(0)
    kx, ka, kl, kr, kb = jax.random.split(key, 5)

    x = jax.random.normal(kx, (N, NFEAT), dtype=jnp.float32)
    adj = (jax.random.uniform(ka, (N, N)) < 0.1).astype(jnp.float32)   # binary 0/1

    # Glorot-uniform-ish init, stored as [F, C] (equivalent to PyTorch x @ W.T).
    limit = (6.0 / (NFEAT + NCLASS)) ** 0.5
    w_l = jax.random.uniform(kl, (NFEAT, NCLASS), minval=-limit, maxval=limit,
                             dtype=jnp.float32)
    w_r = jax.random.uniform(kr, (NFEAT, NCLASS), minval=-limit, maxval=limit,
                             dtype=jnp.float32)
    bias = jax.random.uniform(kb, (1, NCLASS), minval=-0.1, maxval=0.1,
                              dtype=jnp.float32)

    out = graphsage1_forward(x, adj, w_l, w_r, bias)
    out = jax.block_until_ready(out)

    ref = reference_forward(x, adj, w_l, w_r, bias)
    assert out.shape == (N, NCLASS)
    # Tolerance accounts for bf16 MXU inputs on the aggregation matmul (x cast
    # to bf16; f32 accumulation keeps the error ~1e-3 absolute at these sizes).
    assert jnp.allclose(out, ref, atol=1e-2, rtol=1e-2), "mismatch vs reference"

    print("KERNEL_OK")
</pallas_src>

<mosaic_0001>
module attributes {stable_mosaic.version = 11 : i64} {
  func.func @sage_conv_kernel(%arg0: i32, %arg1: memref<64x32xbf16, #tpu.memory_space<vmem>>, %arg2: memref<32x64xbf16, #tpu.memory_space<vmem>>, %arg3: memref<32x32xf32, #tpu.memory_space<vmem>>, %arg4: memref<32x1xf32, #tpu.memory_space<vmem>>, %arg5: memref<32x128xf32, #tpu.memory_space<vmem>>, %arg6: memref<32x128xf32, #tpu.memory_space<vmem>>, %arg7: memref<1x128xf32, #tpu.memory_space<vmem>>, %arg8: memref<32x128xf32, #tpu.memory_space<vmem>>) attributes {dimension_semantics = [#tpu.dimension_semantics<parallel>], iteration_bounds = array<i64: 2>, scalar_prefetch = 0 : i64, scratch_operands = 0 : i64, tpu.core_type = #tpu.core_type<tc>, window_params = [{pipeline_mode = #tpu.pipeline_mode<synchronous>, transform_indices = @transform_0, window_bounds = array<i64: 64, 32>}, {transform_indices = @transform_1, window_bounds = array<i64: 32, 64>}, {transform_indices = @transform_2, window_bounds = array<i64: 32, 32>}, {transform_indices = @transform_3, window_bounds = array<i64: 32, 1>}, {pipeline_mode = #tpu.pipeline_mode<synchronous>, transform_indices = @transform_4, window_bounds = array<i64: 32, 128>}, {pipeline_mode = #tpu.pipeline_mode<synchronous>, transform_indices = @transform_5, window_bounds = array<i64: 32, 128>}, {pipeline_mode = #tpu.pipeline_mode<synchronous>, transform_indices = @transform_6, window_bounds = array<i64: 1, 128>}, {transform_indices = @transform_7, window_bounds = array<i64: 32, 128>}]} {
    %c0 = arith.constant 0 : index
    %c0_0 = arith.constant 0 : index
    %0 = vector.load %arg2[%c0, %c0_0] : memref<32x64xbf16, #tpu.memory_space<vmem>>, vector<32x64xbf16>
    %c0_1 = arith.constant 0 : index
    %c0_2 = arith.constant 0 : index
    %1 = vector.load %arg1[%c0_1, %c0_2] : memref<64x32xbf16, #tpu.memory_space<vmem>>, vector<64x32xbf16>
    %cst = arith.constant dense<0.000000e+00> : vector<32x32xf32>
    %2 = tpu.matmul %0, %1, %cst {dimension_numbers = #tpu.dot_dimension_numbers<[1], [0], [0], [1], [0, 0, 1, 1], [], []>} : vector<32x64xbf16>, vector<64x32xbf16>, vector<32x32xf32> -> vector<32x32xf32>
    %c0_3 = arith.constant 0 : index
    %c0_4 = arith.constant 0 : index
    %3 = vector.load %arg4[%c0_3, %c0_4] : memref<32x1xf32, #tpu.memory_space<vmem>>, vector<32x1xf32>
    %4 = vector.broadcast %3 : vector<32x1xf32> to vector<32x32xf32>
    %5 = arith.mulf %2, %4 : vector<32x32xf32>
    %c0_5 = arith.constant 0 : index
    %c0_6 = arith.constant 0 : index
    %6 = vector.load %arg5[%c0_5, %c0_6] : memref<32x128xf32, #tpu.memory_space<vmem>>, vector<32x128xf32>
    %cst_7 = arith.constant dense<0.000000e+00> : vector<32x128xf32>
    %7 = tpu.matmul %5, %6, %cst_7 {dimension_numbers = #tpu.dot_dimension_numbers<[1], [0], [0], [1], [0, 0, 1, 1], [], []>} : vector<32x32xf32>, vector<32x128xf32>, vector<32x128xf32> -> vector<32x128xf32>
    %c0_8 = arith.constant 0 : index
    %c0_9 = arith.constant 0 : index
    %8 = vector.load %arg3[%c0_8, %c0_9] : memref<32x32xf32, #tpu.memory_space<vmem>>, vector<32x32xf32>
    %c0_10 = arith.constant 0 : index
    %c0_11 = arith.constant 0 : index
    %9 = vector.load %arg6[%c0_10, %c0_11] : memref<32x128xf32, #tpu.memory_space<vmem>>, vector<32x128xf32>
    %cst_12 = arith.constant dense<0.000000e+00> : vector<32x128xf32>
    %10 = tpu.matmul %8, %9, %cst_12 {dimension_numbers = #tpu.dot_dimension_numbers<[1], [0], [0], [1], [0, 0, 1, 1], [], []>} : vector<32x32xf32>, vector<32x128xf32>, vector<32x128xf32> -> vector<32x128xf32>
    %11 = arith.addf %7, %10 : vector<32x128xf32>
    %c0_13 = arith.constant 0 : index
    %c0_14 = arith.constant 0 : index
    %12 = vector.load %arg7[%c0_13, %c0_14] : memref<1x128xf32, #tpu.memory_space<vmem>>, vector<1x128xf32>
    %13 = vector.broadcast %12 : vector<1x128xf32> to vector<32x128xf32>
    %14 = arith.addf %11, %13 : vector<32x128xf32>
    %cst_15 = arith.constant 0.000000e+00 : f32
    %15 = vector.broadcast %cst_15 : f32 to vector<32x128xf32>
    %16 = arith.maximumf %14, %15 : vector<32x128xf32>
    %c0_16 = arith.constant 0 : index
    %c0_17 = arith.constant 0 : index
    %17 = vector.load %arg8[%c0_16, %c0_17] : memref<32x128xf32, #tpu.memory_space<vmem>>, vector<32x128xf32>
    tpu.vector_store %arg8[%c0_16, %c0_17], %16 {strides = array<i32>} : memref<32x128xf32, #tpu.memory_space<vmem>>, vector<32x128xf32>,
    return
  }
  func.func @transform_0(%arg0: i32) -> (i32, i32) {
    %c0_i32 = arith.constant 0 : i32
    %c0_i32_0 = arith.constant 0 : i32
    %c0_i32_1 = arith.constant 0 : i32
    return %c0_i32, %c0_i32_0 : i32, i32
  }
  func.func @transform_1(%arg0: i32) -> (i32, i32) {
    %c0_i32 = arith.constant 0 : i32
    %c0_i32_0 = arith.constant 0 : i32
    return %arg0, %c0_i32 : i32, i32
  }
  func.func @transform_2(%arg0: i32) -> (i32, i32) {
    %c0_i32 = arith.constant 0 : i32
    %c0_i32_0 = arith.constant 0 : i32
    return %arg0, %c0_i32 : i32, i32
  }
  func.func @transform_3(%arg0: i32) -> (i32, i32) {
    %c0_i32 = arith.constant 0 : i32
    %c0_i32_0 = arith.constant 0 : i32
    return %arg0, %c0_i32 : i32, i32
  }
  func.func @transform_4(%arg0: i32) -> (i32, i32) {
    %c0_i32 = arith.constant 0 : i32
    %c0_i32_0 = arith.constant 0 : i32
    %c0_i32_1 = arith.constant 0 : i32
    return %c0_i32, %c0_i32_0 : i32, i32
  }
  func.func @transform_5(%arg0: i32) -> (i32, i32) {
    %c0_i32 = arith.constant 0 : i32
    %c0_i32_0 = arith.constant 0 : i32
    %c0_i32_1 = arith.constant 0 : i32
    return %c0_i32, %c0_i32_0 : i32, i32
  }
  func.func @transform_6(%arg0: i32) -> (i32, i32) {
    %c0_i32 = arith.constant 0 : i32
    %c0_i32_0 = arith.constant 0 : i32
    %c0_i32_1 = arith.constant 0 : i32
    return %c0_i32, %c0_i32_0 : i32, i32
  }
  func.func @transform_7(%arg0: i32) -> (i32, i32) {
    %c0_i32 = arith.constant 0 : i32
    %c0_i32_0 = arith.constant 0 : i32
    return %arg0, %c0_i32 : i32, i32
  }
}

</mosaic_0001>

<bundles_post_ra>
// kernel: tpu_custom_call.1
= control target key start
LH: loop header
LB: loop body
LE: loop exit
PB: predicated region body
PF: predicated region fallthrough
CT: control target
= control target key end

     0   :  { %12 = vsyncpa [#allocation3], 0  ;;  %s1212_s0 = inlined_call_operand.vmem [shape: bf16[64,32], index: 0, kind: input, shape index: {}]   ;;  %s1213_s1 = inlined_call_operand.vmem [shape: bf16[64,64], index: 1, kind: input, shape index: {}]   ;;  %s1214_s2 = inlined_call_operand.vmem [shape: f32[64,32], index: 2, kind: input, shape index: {}]   ;;  %s1215_s3 = inlined_call_operand.vmem [shape: f32[64,1], index: 3, kind: input, shape index: {}]   ;;  %s1216_s4 = inlined_call_operand.vmem [shape: f32[32,128], index: 4, kind: input, shape index: {}]   ;;  %s1217_s5 = inlined_call_operand.vmem [shape: f32[32,128], index: 5, kind: input, shape index: {}]   ;;  %s1218_s6 = inlined_call_operand.vmem [shape: f32[1,128], index: 6, kind: input, shape index: {}]   ;;  %s1219_s7 = inlined_call_operand.hbm [shape: f32[64,128], index: 7, kind: output, shape index: {}]  }
   0x1   :  { %14 = vsyncpa [#allocation3 + $0x1], 0  ;;  %s1055_s24 = smov 0   ;;  %s1057_s25 = smov 0  }
   0x2   :  { %s1059_s26 = smov 0   ;;  %s1061_s27 = smov 0  }
   0x3 LB: > { %s1076_s28 = sadd.s32 4294967295, %s1009_s27   ;;  %s781_s29 = sadd.s32 4294967294, %s1009_s27   ;;  %s1009_s27 = sphi %s1061_s27, %s1225_s27   ;;  %s1005_s26 = sphi %s1059_s26, %s1224_s26   ;;  %s1001_s25 = sphi %s1057_s25, %s1223_s25   ;;  %s997_s24 = sphi %s1055_s24, %s1222_s24  }
   0x4   : > { %s1080_s30 = sadd.s32 1, %s1009_s27   ;;  %s189_s8 = sadd.s32 1, %s1005_s26 }
   0x5   : > { %s186_s9 = ssub.s32 %s1009_s27, %s1080_s30  ;;  %p199_p0 = scmp.ne.s32.totalorder %s1005_s26, %s1001_s25 }
   0x6   : > { %p187_p1 = scmp.eq.s32.totalorder %s186_s9, 0  ;;  %p200_p2 = scmp.eq.s32.totalorder %s1076_s28, 1 }
   0x7   : > { %p205_p3 = scmp.ne.s32.totalorder %s1001_s25, %s997_s24  ;;  %p206_p4 = scmp.eq.s32.totalorder %s781_s29, 1 }
   0x8   : > { %s1091_s10 = scalar_select %p187_p1, %s1005_s26, %s189_s8  }
   0x9   : > { %p1093_p5 = por %p200_p2, %p199_p0  ;;  %p1097_p6 = por %p206_p4, %p205_p3 }
   0xa   : > { %p784_p7 = scmp.ge.s32.totalorder %s1009_s27, 1  ;;  %p263_p8 = scmp.lt.s32.totalorder %s1009_s27, 3 }
   0xc   : > { %p264_p9 = pnand %p784_p7, %p263_p8 }
   0xd   : > { %v941_v0 = vld [vmem:[%s1212_s0] sm:$0xff] (!%p264_p9)   ;;  %s786_s15 = sshll.u32 (!%p264_p9), %s1076_s28, 2  ;;  %v942_v1 = vld [vmem:[%s1212_s0 + $0x8] sm:$0xff] (!%p264_p9)   ;;  %v943_v2 = vld [vmem:[%s1212_s0 + $0x10] sm:$0xff] (!%p264_p9)   ;;  %v1011_v6 = vmov (!%p264_p9), 0   ;;  %vm371_vm0 = vcmask (!%p264_p9), 523264  }
   0xe   : > { %267 = sbr.rel (%p264_p9) target bundleno = 483 (0x1e3), region = 48  ;;  %p306_p10 = scmp.lt.s32.totalorder (!%p264_p9), %s786_s15, 7  ;;  %837 = vmatprep.subr.bf16.mxu0 (!%p264_p9), %v941_v0  ;;  %v463_v3 = vld [vmem:[%s1217_s5] sm:$0xff] (!%p264_p9)  ;;  %v464_v4 = vld [vmem:[%s1217_s5 + $0x8] sm:$0xff] (!%p264_p9)  ;;  %v465_v5 = vld [vmem:[%s1217_s5 + $0x10] sm:$0xff] (!%p264_p9)  ;;  %939 = vset.pattern.permute.xlu0 (!%p264_p9), %v1011_v6  ;;  %vm467_vm1 = vcmask (!%p264_p9), 261120  }
   0xf   : > { %838 = vmatpush3.bf16.msra.mxu0 (!%p264_p9), %v941_v0  ;;  %940 = vset.pattern.permute.xlu1 (!%p264_p9), %v1011_v6  ;;  %v877_v7 = vpack.c.bf16 (!%p264_p9), %v464_v4, %v463_v3  ;;  %v466_v8 = vld [vmem:[%s1217_s5 + $0x18] sm:$0xff] (!%p264_p9)  ;;  %v455_v15 = vld [vmem:[%s1216_s4] sm:$0xff] (!%p264_p9)  ;;  %v456_v18 = vld [vmem:[%s1216_s4 + $0x8] sm:$0xff] (!%p264_p9)  ;;  %s814_s14 = sshll.u32 (!%p264_p9), %s1076_s28, 9  ;;  %s1012_s20 = smov (!%p264_p9), [#allocation2]  }
  0x10   : > { %839 = vmatprep.subr.bf16.mxu0 (!%p264_p9), %v942_v1  ;;  %v881_v9 = vpack.c.bf16 (!%p264_p9), %v466_v8, %v465_v5  ;;  %v944_v11 = vld [vmem:[%s1212_s0 + $0x18] sm:$0xff] (!%p264_p9)   ;;  %v885_v19 = vpack.c.bf16 (!%p264_p9), %v456_v18, %v455_v15  ;;  %v457_v22 = vld [vmem:[%s1216_s4 + $0x10] sm:$0xff] (!%p264_p9)  ;;  %v808_v39 = vld [vmem:[%s1218_s6] ss:$0 sm:$0xff] (!%p264_p9)  ;;  %s1169_s18 = scalar_lea.hbm (!%p264_p9), %s1219_s7, %s814_s14  ;;  %s951_s21 = sshll.u32 (!%p264_p9), %s1012_s20, 4  ;;  %s952_s21 = int_to_ptr.vmem [resolvable:$false] %s951_s21 }
  0x11   : > { %878 = vmatprep.subr.bf16.mxu1 (!%p264_p9), %v877_v7  ;;  %v458_v23 = vld [vmem:[%s1216_s4 + $0x18] sm:$0xff] (!%p264_p9) }
  0x12   : > { %880 = vmatpush3.bf16.msra.mxu1 (!%p264_p9), %v877_v7  ;;  %v889_v25 = vpack.c.bf16 (!%p264_p9), %v458_v23, %v457_v22 }
  0x13   : > { %840 = vmatpush3.bf16.msra.mxu0 (!%p264_p9), %v942_v1  ;;  %882 = vmatprep.subr.bf16.mxu1 (!%p264_p9), %v881_v9 }
  0x14   : > { %841 = vmatprep.subr.bf16.mxu0 (!%p264_p9), %v943_v2 }
  0x15   : > { %s1227_s15 = smov (!%p306_p10, %s786_s15), 7 }
  0x16   : > { %s787_s9 = sshll.u32 %s1227_s15, 2  ;;  %s789_s13 = sshll.u32 %s1227_s15, 3  ;;  %884 = vmatpush3.bf16.msra.mxu1 %v881_v9 }
  0x17   : > { %s309_s19 = scalar_lea.vmem %s1213_s1, %s787_s9  ;;  %s321_s22 = scalar_lea.vmem %s1215_s3, %s789_s13  ;;  %842 = vmatpush3.bf16.msra.mxu0 %v943_v2  ;;  %886 = vmatprep.subr.bf16.mxu1 %v885_v19 }
  0x18   : > { %v945_v10 = vld [vmem:[%s309_s19] sm:$0xff]   ;;  %v429_v13 = vld [vmem:[%s321_s22 + $0x10] sm:$0xff]  ;;  %s315_s9 = scalar_lea.vmem %s1214_s2, %s789_s13  ;;  %v428_v16 = vld [vmem:[%s321_s22 + $0x8] sm:$0xff]  ;;  %843 = vmatprep.subr.bf16.mxu0 %v944_v11 }
  0x19   : > { %845 = vmatprep.mubr.msk.bf16.mxu0 %vm371_vm0, %v945_v10  ;;  %v427_v12 = vld [vmem:[%s321_s22] sm:$0xff]  ;;  %443 = vperm.xlu1 %940, %v429_v13   ;;  %v430_v17 = vld [vmem:[%s321_s22 + $0x18] sm:$0xff]  ;;  %v460_v20 = vld [vmem:[%s315_s9 + $0x8] sm:$0xff]  ;;  %s953_s22 = scalar_lea.vmem %s952_s21, 1024 }
  0x1a   : > { %433 = vperm.xlu0 %939, %v427_v12   ;;  %v459_v14 = vld [vmem:[%s315_s9] sm:$0xff]  ;;  %v946_v21 = vld [vmem:[%s309_s19 + $0x8] sm:$0xff]   ;;  %v461_v24 = vld [vmem:[%s315_s9 + $0x10] sm:$0xff]  ;;  %s302_s19 = sand.u32 1, %s1001_s25  }
  0x1b   : > { %857 = vmatprep.mubr.msk.f32.mxu1 %vm467_vm1, %v459_v14  ;;  %844 = vmatpush3.bf16.msra.mxu0 %v944_v11  ;;  %v462_v26 = vld [vmem:[%s315_s9 + $0x18] sm:$0xff]  ;;  %s785_s29 = sshll.u32 %s302_s19, 5  ;;  %s1171_s28 = scalar_lea.sflag [#allocation3], %s302_s19 }
  0x1c   : > { %858 = vmatmul.mubr.msk.f32.vlgmr.msra.gmra.mrb[0].mxu1 %vm467_vm1, %v460_v20  ;;  %s304_s8 = scalar_lea.vmem [#allocation2], %s785_s29 }
  0x1d   : > { %448 = vperm.xlu1 %940, %v430_v17   ;;  %888 = vmatpush3.bf16.msra.mxu1 %v885_v19  ;;  %s695_s9 = sshll.u32 %s304_s8, 4  ;;  %s1164_s9 = int_to_ptr.vmem [resolvable:$true] %s695_s9 }
  0x1e   : > { %438 = vperm.xlu0 %939, %v428_v16   ;;  %846 = vmatmul.mubr.msk.bf16.vlgmr.msra.gmra.mrb[0].mxu0 %vm371_vm0, %v946_v21  ;;  %s947_s13 = scalar_lea.vmem %s1164_s9, 512  ;;  %p954_p0 = scmp.lt.s32.totalorder %s1164_s9, %s952_s21 }
  0x1f   : > { %860 = vmatprep.mubr.msk.f32.mxu1 %vm467_vm1, %v461_v24  ;;  %890 = vmatprep.subr.bf16.mxu1 %v889_v25  ;;  %p948_p11 = scmp.ne.s32.totalorder %s1164_s9, %s947_s13  ;;  %p955_p1 = scmp.lt.s32.totalorder %s953_s22, %s947_s13 }
  0x20   : > { %861 = vmatmul.mubr.msk.f32.gmra.mrb[2].mxu1 %vm467_vm1, %v462_v26 }
  0x21   : > { %892 = vmatpush3.bf16.msra.mxu1 %v889_v25  ;;  %p949_p12 = pnand %p948_p11, %p1093_p5  ;;  %p956_p2 = por %p955_p1, %p954_p0 }
  0x23   : > { %p950_p13 = pneg %p949_p12 }
  0x25   : > { %p957_p3 = pnand %p956_p2, %p950_p13 }
  0x98   : > { %v444_v28 = vpop.permute.xlu1 %443 }
  0x99   : > { %v434_v27 = vpop.permute.xlu0 %433 }
  0x9c   : > { %v449_v37 = vpop.permute.xlu1 %448 }
  0x9d   : > { %v439_v33 = vpop.permute.xlu0 %438 }
  0xf1   : > { %v847_v29 = vpop.f32.mrb[0].mxu0 }
  0xf2   : > { %v412_v30 = vpop.f32.mrb[1].mxu0  ;;  %v453_v36 = vmul.f32 %v847_v29, %v444_v28 }
  0xf3   : > { %v451_v31 = vmul.f32 %v434_v27, %v412_v30  ;;  %v848_v32 = vpop.f32.mrb[2].mxu0 }
  0xf4   : > { %v415_v34 = vpop.f32.mrb[3].mxu0  ;;  %v454_v38 = vmul.f32 %v848_v32, %v449_v37 }
  0xf5   : > { %v452_v35 = vmul.f32 %v439_v33, %v415_v34  ;;  %871 = vmatprep.mubr.msk.f32.mxu1 %vm467_vm1, %v451_v31 }
  0xf7   : > { %872 = vmatmul.mubr.msk.f32.vlgmr.msra.gmra.mrb[0].mxu1 %vm467_vm1, %v452_v35 }
  0xf8   : > { %874 = vmatprep.mubr.msk.f32.mxu1 %vm467_vm1, %v453_v36 }
  0xfb   : > { %875 = vmatmul.mubr.msk.f32.gmra.mrb[2].mxu1 %vm467_vm1, %v454_v38 }
 0x1ca   : > { %v873_v40 = vpop.f32.mrb[0].mxu1 }
 0x1cb   : > { %v670_v41 = vadd.f32 %v873_v40, %v808_v39  ;;  %v643_v42 = vpop.f32.mrb[1].mxu1 }
 0x1cc   : > { %v669_v43 = vadd.f32 %v808_v39, %v643_v42 }
 0x1cd   : > { %v674_v44 = vmax.f32 %v670_v41, 0.0 }
 0x1ce   : > { %v673_v45 = vmax.f32 %v669_v43, 0.0  ;;  %v876_v46 = vpop.f32.mrb[2].mxu1 }
 0x1cf   : > { %678 = vst [vmem:[%s304_s8 + $0x8] sm:$0xff] %v674_v44  ;;  %v672_v47 = vadd.f32 %v876_v46, %v808_v39  ;;  %v653_v48 = vpop.f32.mrb[3].mxu1 }
 0x1d0   : > { %677 = vst [vmem:[%s304_s8] sm:$0xff] %v673_v45  ;;  %v671_v49 = vadd.f32 %v808_v39, %v653_v48 }
 0x1d1   : > { %v676_v50 = vmax.f32 %v672_v47, 0.0 }
 0x1d2   : > { %v675_v51 = vmax.f32 %v671_v49, 0.0 }
 0x1d3   : > { %680 = vst [vmem:[%s304_s8 + $0x18] sm:$0xff] %v676_v50 }
 0x1d4   : > { %679 = vst [vmem:[%s304_s8 + $0x10] sm:$0xff] %v675_v51 }
 0x1d5   : > { %960 = shalt.err (!%p957_p3)
}
 0x1d6   : > { %s961_s19 = scalar_lea.hbm %s1169_s18, 512  ;;  %s965_s29 = scalar_lea.hbm %s1219_s7, 1024 }
 0x1d7   : > { %p962_p4 = scmp.ne.s32.totalorder %s1169_s18, %s961_s19  ;;  %p966_p9 = scmp.lt.u32.totalorder %s1169_s18, %s1219_s7 }
 0x1d8   : > { %p967_p10 = scmp.lt.u32.totalorder %s965_s29, %s961_s19  ;;  %p969_p12 = scmp.lt.u32.totalorder %s961_s19, %s1169_s18 }
 0x1d9   : > { %p963_p7 = pnand %p962_p4, %p1093_p5 }
 0x1da   : > { %p968_p11 = por %p967_p10, %p966_p9 }
 0x1db   : > { %p964_p8 = pneg %p963_p7 }
 0x1dc   : > { %p970_p13 = por %p969_p12, %p968_p11 }
 0x1de   : > { %p971_p0 = pnand %p970_p13, %p964_p8 }
 0x1e0   : > { %974 = shalt.err (!%p971_p0)
}
 0x1e1   : > { %s1013_s16 = smov 128   ;;  %s1014_s17 = smov 8  }
 0x1e2   : > { %897 = dma.vmem_to_hbm [thread:$0]  (%p1093_p5), %s1164_s9, 512, %s1169_s18, %s1171_s28, %s1013_s16, %s1013_s16, %s1014_s17  }
 0x1e3 PF: > { %p903_p1 = scmp.ge.s32.totalorder %s1009_s27, 2  ;;  %s710_s13 = sand.u32 1, %s997_s24  }
 0x1e4   : > { %s711_s20 = scalar_lea.sflag [#allocation3], %s710_s13 }
 0x1e5   : > { %p900_p2 = pnand %p903_p1, %p1097_p6 }
 0x1e7   : > { %992 = dma.done.wait (!%p900_p2), %s711_s20, 512  }
 0x1e8   : > { %994 = vsyncadd (!%p900_p2), %s711_s20, 4294966784  ;;  %p17_p3 = scmp.ge.s32.totalorder %s1080_s30, 4   ;;  %s1222_s24 = smov %s1001_s25 }
 0x1e9   : > { %s1223_s25 = smov %s1005_s26  ;;  %s1224_s26 = smov %s1091_s10 }
 0x1ea   : > { %s1225_s27 = smov %s1080_s30  ;;  %19 = sbr.rel (!%p17_p3) target bundleno = 3 (0x3), region = 89 }
 0x1f1   :  { %716 = vsyncpa [#allocation3], 1 }
 0x1f2   :  { %718 = vsyncpa [#allocation3 + $0x1], 1 }

</bundles_post_ra>
